<compile_context>
chip_gen: v5e
topology: v5e:2x2
jax: 0.10.0
libtpu: 0.0.40
codegen_flags: <defaults>
</compile_context>

<pallas_src>
import jax
import jax.numpy as jnp
from jax.experimental import pallas as pl
from jax.experimental.pallas import tpu as pltpu


def _drop_path_kernel(scale_ref, x_ref, o_ref):
    """One grid step == one (TB, TF) tile.

    scale_ref : (TB, 1)  per-sample scale (0 or 1/keep_prob), float32
    x_ref     : (TB, TF) input tile (x.dtype)
    o_ref     : (TB, TF) output tile (x.dtype)
    """
    # Broadcast multiply; f32 math, cast back to the storage dtype on write.
    o_ref[...] = (x_ref[...] * scale_ref[...]).astype(o_ref.dtype)


def _cdiv(a, b):
    return -(-a // b)


# Minimum sublane tile per element size so packed dtypes fill whole vregs.
_SUBLANE_MIN = {4: 8, 2: 16, 1: 32}


def _hw_config():
    """Return (vmem_limit_bytes, per-block byte budget) per TPU generation."""
    kind = ""
    try:
        kind = jax.devices()[0].device_kind.lower()
    except Exception:
        pass
    if "v7" in kind or "7x" in kind:
        # v7x: 64 MiB physical VMEM per TC -> conservative scoped limit;
        # 4 MiB blocks => in+out double-buffering ~16 MiB.
        return 48 << 20, 4 << 20
    if "v5 lite" in kind or "v5e" in kind or "v5lite" in kind:
        # v5e: 16 MiB scoped default is the binding constraint; raise it and
        # keep blocks ~3 MiB.
        return 64 << 20, 3 << 20
    # v6e and other 128 MiB-VMEM parts: 4 MiB blocks, roomy scoped limit.
    return 64 << 20, 4 << 20


def _choose_tiles(B, F, itemsize, budget):
    """Pick (TB, TF) tiles: lane-dense, 128/8-legal, ~`budget` bytes each."""
    sub_min = _SUBLANE_MIN.get(itemsize, 8)
    lane_cap = 8192  # elements along the lane axis

    # ---- lane (last) axis -------------------------------------------------
    if F <= lane_cap:
        TF = F  # full extent: always a legal block dim, even if not 128-aligned
    else:
        # Balanced 128-aligned tiles; Pallas masks the ragged last tile.
        n_f = _cdiv(F, lane_cap)
        TF = min(lane_cap, _cdiv(_cdiv(F, n_f), 128) * 128)

    # ---- sublane (second-to-last) axis -------------------------------------
    row_bytes = max(1, TF * itemsize)
    max_tb = min(4096, max(sub_min, budget // row_bytes))
    if B <= max_tb:
        TB = B  # full extent: always legal
    else:
        TB = max(sub_min, (max_tb // sub_min) * sub_min)

    # ---- ensure a non-trivial grid so both v7x TensorCores get work ---------
    if _cdiv(B, TB) * _cdiv(F, TF) == 1 and B * F * itemsize > (1 << 20) \
            and B >= 2 * sub_min:
        TB = max(sub_min, ((B // 2) // sub_min) * sub_min)

    return TB, TF


def drop_path(x, key, drop_prob: float = 0.0, training: bool = False,
              donate_x: bool = False):
    """Pallas equivalent of the PyTorch drop_path forward."""
    if drop_prob == 0.0 or not training:
        return x
    if not (0.0 <= drop_prob < 1.0):
        raise ValueError(f"drop_prob must be in [0, 1), got {drop_prob}")
    keep_prob = 1.0 - float(drop_prob)

    B = x.shape[0]
    F = 1
    for d in x.shape[1:]:
        F *= d
    x2 = x.reshape(B, F)

    # Per-sample uniforms (mirrors torch.rand((B, 1, ..., 1))). Tiny -> JAX glue.
    rand = jax.random.uniform(key, (B,), dtype=jnp.float32)
    # Fold Bernoulli + rescale into one f32 per-sample scalar: 0 or 1/keep_prob.
    scale = (jnp.floor(keep_prob + rand) * (1.0 / keep_prob)).reshape(B, 1)
    scale = scale.astype(jnp.float32)

    itemsize = jnp.dtype(x.dtype).itemsize
    vmem_limit, budget = _hw_config()
    TB, TF = _choose_tiles(B, F, itemsize, budget)
    grid = (_cdiv(B, TB), _cdiv(F, TF))

    kwargs = {}
    if donate_x:
        # Reuse x2's HBM buffer for the output when the caller donates x.
        kwargs["input_output_aliases"] = {1: 0}

    out2 = pl.pallas_call(
        _drop_path_kernel,
        out_shape=jax.ShapeDtypeStruct((B, F), x.dtype),
        grid=grid,
        in_specs=[
            pl.BlockSpec((TB, 1), lambda i, j: (i, 0)),   # per-sample scale column
            pl.BlockSpec((TB, TF), lambda i, j: (i, j)),  # dense data tile
        ],
        out_specs=pl.BlockSpec((TB, TF), lambda i, j: (i, j)),
        compiler_params=pltpu.CompilerParams(
            dimension_semantics=("parallel", "parallel"),
            vmem_limit_bytes=vmem_limit,
        ),
        **kwargs,
    )(scale, x2)
    return out2.reshape(x.shape)


class DropPath:
    """Drop paths (Stochastic Depth) per sample."""

    def __init__(self, drop_prob=None):
        self.drop_prob = drop_prob
        self.training = True  # no parameters; only a static drop_prob

    def __call__(self, x, key):
        p = 0.0 if self.drop_prob is None else float(self.drop_prob)
        return drop_path(x, key, p, self.training)


if __name__ == "__main__":
    key = jax.random.PRNGKey(0)
    kx, kd, kx2, kd2 = jax.random.split(key, 4)

    # ---- f32 test -----------------------------------------------------------
    B, N, D = 2, 8, 32
    x = jax.random.normal(kx, (B, N, D), dtype=jnp.float32)
    module = DropPath(drop_prob=0.25)

    y = jax.block_until_ready(module(x, kd))

    keep_prob = 1.0 - 0.25
    rand = jax.random.uniform(kd, (B,), dtype=jnp.float32)
    rt = jnp.floor(keep_prob + rand).reshape(B, 1, 1)
    ref = (x / keep_prob) * rt
    assert jnp.allclose(y, ref, atol=1e-5, rtol=1e-5), "f32 kernel mismatch"

    # ---- bf16 test (exercises dtype-aware tiling + f32 scale path) ----------
    xb = jax.random.normal(kx2, (4, 16, 48), dtype=jnp.bfloat16)
    yb = jax.block_until_ready(drop_path(xb, kd2, 0.25, training=True))
    rand_b = jax.random.uniform(kd2, (4,), dtype=jnp.float32)
    rt_b = jnp.floor(keep_prob + rand_b).reshape(4, 1, 1)
    ref_b = (xb.astype(jnp.float32) * (rt_b / keep_prob)).astype(jnp.bfloat16)
    assert jnp.allclose(yb.astype(jnp.float32), ref_b.astype(jnp.float32),
                        atol=1e-2, rtol=1e-2), "bf16 kernel mismatch"

    # ---- eval mode / drop_prob == 0: identity passthrough --------------------
    module.training = False
    y_eval = jax.block_until_ready(module(x, kd))
    assert jnp.array_equal(y_eval, x)

    print("KERNEL_OK")
</pallas_src>

<mosaic_0001>
module attributes {stable_mosaic.version = 11 : i64} {
  func.func @_drop_path_kernel(%arg0: i32, %arg1: i32, %arg2: memref<2x1xf32, #tpu.memory_space<vmem>>, %arg3: memref<2x256xf32, #tpu.memory_space<vmem>>, %arg4: memref<2x256xf32, #tpu.memory_space<vmem>>) attributes {dimension_semantics = [#tpu.dimension_semantics<parallel>, #tpu.dimension_semantics<parallel>], iteration_bounds = array<i64: 1, 1>, scalar_prefetch = 0 : i64, scratch_operands = 0 : i64, tpu.core_type = #tpu.core_type<tc>, window_params = [{transform_indices = @transform_0, window_bounds = array<i64: 2, 1>}, {transform_indices = @transform_1, window_bounds = array<i64: 2, 256>}, {transform_indices = @transform_2, window_bounds = array<i64: 2, 256>}]} {
    %c0 = arith.constant 0 : index
    %c0_0 = arith.constant 0 : index
    %0 = vector.load %arg3[%c0, %c0_0] : memref<2x256xf32, #tpu.memory_space<vmem>>, vector<2x256xf32>
    %c0_1 = arith.constant 0 : index
    %c0_2 = arith.constant 0 : index
    %1 = vector.load %arg2[%c0_1, %c0_2] : memref<2x1xf32, #tpu.memory_space<vmem>>, vector<2x1xf32>
    %2 = vector.broadcast %1 : vector<2x1xf32> to vector<2x256xf32>
    %3 = arith.mulf %0, %2 : vector<2x256xf32>
    %c0_3 = arith.constant 0 : index
    %c0_4 = arith.constant 0 : index
    %4 = vector.load %arg4[%c0_3, %c0_4] : memref<2x256xf32, #tpu.memory_space<vmem>>, vector<2x256xf32>
    tpu.vector_store %arg4[%c0_3, %c0_4], %3 {strides = array<i32>} : memref<2x256xf32, #tpu.memory_space<vmem>>, vector<2x256xf32>,
    return
  }
  func.func @transform_0(%arg0: i32, %arg1: i32) -> (i32, i32) {
    %c0_i32 = arith.constant 0 : i32
    %c0_i32_0 = arith.constant 0 : i32
    return %arg0, %c0_i32 : i32, i32
  }
  func.func @transform_1(%arg0: i32, %arg1: i32) -> (i32, i32) {
    %c0_i32 = arith.constant 0 : i32
    return %arg0, %arg1 : i32, i32
  }
  func.func @transform_2(%arg0: i32, %arg1: i32) -> (i32, i32) {
    %c0_i32 = arith.constant 0 : i32
    return %arg0, %arg1 : i32, i32
  }
}

</mosaic_0001>

<bundles_post_ra>
// kernel: tpu_custom_call.1
= control target key start
LH: loop header
LB: loop body
LE: loop exit
PB: predicated region body
PF: predicated region fallthrough
CT: control target
= control target key end

     0   :  { %7 = vsyncpa [#allocation3], 0  ;;  %s141_s0 = inlined_call_operand.vmem [shape: f32[2,1], index: 0, kind: input, shape index: {}]   ;;  %s142_s1 = inlined_call_operand.hbm [shape: f32[2,256], index: 1, kind: input, shape index: {}]   ;;  %s143_s2 = inlined_call_operand.hbm [shape: f32[2,256], index: 2, kind: output, shape index: {}]  }
   0x1   :  { %8 = vsyncpa [#allocation4], 0  ;;  %s16_s11 = sshll.u32 %s142_s1, 4  ;;  %s113_s12 = smov [#allocation2]   ;;  %s17_s11 = int_to_ptr.hbm [resolvable:$true] %s16_s11 }
   0x2   :  { %s18_s13 = sshll.u32 %s113_s12, 4  ;;  %s19_s13 = int_to_ptr.vmem [resolvable:$true] %s18_s13 }
   0x3   :  { %21 = dma.hbm_to_vmem [thread:$0]  %s17_s11, 64, %s19_s13, [#allocation3]  }
   0x4   :  { %109 = dma.done.wait [#allocation3], 64  }
   0x5   :  { %110 = vsyncadd [#allocation3], 4294967232  ;;  %v114_v0 = vmov 0   ;;  %v27_v1 = vld [vmem:[%s141_s0] sm:$0x3]  ;;  %s116_s1 = smov [#allocation5]  }
   0x6   :  { %60 = vset.pattern.permute.xlu0 %v114_v0  ;;  %v115_v2 = vmov 269488144   ;;  %v26_v6 = vld [vmem:[#allocation2] sm:$0xf]  ;;  %s44_s16 = sshll.u32 %s116_s1, 4  ;;  %s46_s19 = sshll.u32 %s143_s2, 4  ;;  %s45_s16 = int_to_ptr.vmem [resolvable:$true] %s44_s16  ;;  %s47_s19 = int_to_ptr.hbm [resolvable:$true] %s46_s19 }
   0x7   :  { %30 = vperm.xlu0 %60, %v27_v1   ;;  %v33_v3 = vunpack.c.l.s4 %v115_v2 }
   0x9   :  { %v34_v4 = vunpack.c.0.s8 %v33_v3 }
  0x79   :  { %v31_v5 = vpop.permute.xlu0 %30 }
  0x7a   :  { %v35_v7 = vperm.slane %v31_v5, %v34_v4 }
  0x7c   :  { %v37_v8 = vmul.f32 %v35_v7, %v26_v6 }
  0x7e   :  { %38 = vst [vmem:[#allocation5] sm:$0xf] %v37_v8 }
  0x7f   :  { %49 = dma.vmem_to_hbm [thread:$0]  %s45_s16, 64, %s47_s19, [#allocation4]  }
  0x80   :  { %111 = dma.done.wait [#allocation4], 64  }
  0x81   :  { %112 = vsyncadd [#allocation4], 4294967232 }
  0x82   :  { %54 = vsyncpa [#allocation3], 1 }
  0x83   :  { %55 = vsyncpa [#allocation4], 1 }

</bundles_post_ra>
